<compile_context>
chip_gen: v7x
topology: tpu7x:2x2x1
jax: 0.10.0
libtpu: 0.0.40
codegen_flags: <defaults>
</compile_context>

<pallas_src>
import math
import functools

import jax
import jax.numpy as jnp
from jax.experimental import pallas as pl
from jax.experimental.pallas import tpu as pltpu


# ---------------------------------------------------------------------------
# Kernels
# ---------------------------------------------------------------------------

def _lora_linear_kernel(x_ref, wt_ref, u_ref, bt_ref, bias_ref, o_ref, acc_ref,
                        *, tk):
    """One (i, j) output tile; K streamed along grid axis 2.

    x_ref   : (tm, Kp)   resident bf16 row panel (constant over j, k)
    wt_ref  : (tk, tn)   W^T chunk, canonical (K, N) layout, bf16
    u_ref   : (tm, r)    precomputed u = x @ A^T, bf16 (constant over j, k)
    bt_ref  : (r, tn)    B^T chunk, bf16
    bias_ref: (1, tn)    f32 bias
    o_ref   : (tm, tn)   output tile (original x dtype)
    acc_ref : (tm, tn)   f32 accumulator scratch
    """
    k = pl.program_id(2)
    nk = pl.num_programs(2)

    k0 = pl.multiple_of(k * tk, tk)
    partial = jnp.dot(x_ref[:, pl.ds(k0, tk)], wt_ref[...],
                      preferred_element_type=jnp.float32)

    @pl.when(k == 0)
    def _first():
        acc_ref[...] = partial          # direct write: saves a zero-init store pass

    @pl.when(k > 0)
    def _rest():
        acc_ref[...] += partial

    @pl.when(k == nk - 1)
    def _finalize():
        low = jnp.dot(u_ref[...], bt_ref[...],
                      preferred_element_type=jnp.float32)
        o_ref[...] = (acc_ref[...] + low + bias_ref[...]).astype(o_ref.dtype)
        # TODO(synk): training-mode dropout (p=0.5) not applied; eval dropout == identity.


def _plain_linear_kernel(x_ref, wt_ref, bias_ref, o_ref, acc_ref, *, tk):
    k = pl.program_id(2)
    nk = pl.num_programs(2)

    k0 = pl.multiple_of(k * tk, tk)
    partial = jnp.dot(x_ref[:, pl.ds(k0, tk)], wt_ref[...],
                      preferred_element_type=jnp.float32)

    @pl.when(k == 0)
    def _first():
        acc_ref[...] = partial

    @pl.when(k > 0)
    def _rest():
        acc_ref[...] += partial

    @pl.when(k == nk - 1)
    def _finalize():
        o_ref[...] = (acc_ref[...] + bias_ref[...]).astype(o_ref.dtype)


# ---------------------------------------------------------------------------
# Wrapper: one-time param prep + hot-path forward
# ---------------------------------------------------------------------------

def _round_up(v, m):
    return ((v + m - 1) // m) * m


def _pad2d(arr, rows, cols):
    r, c = arr.shape
    if r == rows and c == cols:
        return arr
    return jnp.pad(arr, ((0, rows - r), (0, cols - c)))


def prepare_lora_linear(weight, bias, lora_a=None, lora_b=None, *,
                        merge=True, rank=16,
                        tn=1024, tk=512,
                        compute_dtype=jnp.bfloat16):
    """One-time prep: pad / pre-transpose / pre-cast the frozen parameters.

    Call this once outside the hot path so each forward only pays for the x
    cast/pad and the kernel itself.
    """
    out_features, in_features = weight.shape
    use_lora = bool(merge) and rank > 0 and lora_a is not None and lora_b is not None

    # v6e / v7x MXU is 2x256x256 -> keep matmul tile dims multiples of 256.
    tn = min(tn, _round_up(out_features, 256))
    tk = min(tk, _round_up(in_features, 256))
    Np = _round_up(out_features, tn)
    Kp = _round_up(in_features, tk)

    # W^T in canonical (K, N) layout, bf16 for the MXU (one-time relayout of the
    # frozen weight).
    wt_p = _pad2d(weight.T.astype(compute_dtype), Kp, Np)
    # TODO(synk): on v7x the frozen W could additionally be quantized to fp8 with
    # a per-output-channel scale applied in the finalize step (fp8 MXU, no int path).
    bias_p = _pad2d(bias.astype(jnp.float32).reshape(1, out_features), 1, Np)

    params = dict(
        wt=wt_p, bias=bias_p,
        in_features=int(in_features), out_features=int(out_features),
        Kp=int(Kp), Np=int(Np), tn=int(tn), tk=int(tk),
        use_lora=use_lora, compute_dtype=compute_dtype,
        at=None, bt=None, r_pad=0,
    )
    if use_lora:
        r = lora_a.shape[0]
        r_pad = _round_up(r, 128)                                    # lane-dense rank
        at_p = _pad2d(lora_a.T.astype(compute_dtype), Kp, r_pad)     # A^T : (Kp, r)
        bt_p = _pad2d(lora_b.T.astype(compute_dtype), r_pad, Np)     # B^T : (r, Np)
        params.update(at=at_p, bt=bt_p, r_pad=int(r_pad))
    return params


def lora_linear_forward(x, params, *, tm=512):
    """Forward pass matching LoraLinear.forward (eval mode)."""
    in_features = params["in_features"]
    out_features = params["out_features"]
    Kp, Np, tn, tk = params["Kp"], params["Np"], params["tn"], params["tk"]
    compute_dtype = params["compute_dtype"]
    use_lora = params["use_lora"]

    orig_shape = x.shape
    out_dtype = x.dtype
    x2d = x.reshape(-1, in_features)
    M = x2d.shape[0]

    cbytes = jnp.dtype(compute_dtype).itemsize
    obytes = jnp.dtype(out_dtype).itemsize

    # Adapt tm to M, then keep the double-buffered resident x row panel within a
    # VMEM budget that is also safe on v7x (64 MiB physical).
    tm = min(tm, _round_up(M, 8))
    panel_budget = 20 * 1024 * 1024
    while tm > 128 and 2 * tm * Kp * cbytes > panel_budget:
        tm //= 2
    Mp = _round_up(M, tm)

    x_p = _pad2d(x2d.astype(compute_dtype), Mp, Kp)

    grid = (Mp // tm, Np // tn, Kp // tk)
    out_shape = jax.ShapeDtypeStruct((Mp, Np), out_dtype)
    compiler_params = pltpu.CompilerParams(
        dimension_semantics=("parallel", "parallel", "arbitrary"),
        vmem_limit_bytes=48 * 1024 * 1024,
    )

    if use_lora:
        r_pad = params["r_pad"]
        # Low-rank projection u = x @ A^T precomputed once (tiny (M, r) matmul).
        # Keeps the kernel free of any cross-N carry so N can be "parallel".
        u_p = jnp.dot(x_p, params["at"],
                      preferred_element_type=jnp.float32).astype(compute_dtype)

        flops = 2 * Mp * Np * Kp + 2 * Mp * r_pad * Np
        bytes_accessed = ((Mp * Kp + Kp * Np + Mp * r_pad + r_pad * Np) * cbytes
                          + Np * 4 + Mp * Np * obytes)
        out_p = pl.pallas_call(
            functools.partial(_lora_linear_kernel, tk=tk),
            out_shape=out_shape,
            grid_spec=pltpu.PrefetchScalarGridSpec(
                num_scalar_prefetch=0,
                grid=grid,
                in_specs=[
                    pl.BlockSpec((tm, Kp), lambda i, j, k: (i, 0)),      # x row panel
                    pl.BlockSpec((tk, tn), lambda i, j, k: (k, j)),      # W^T (K, N)
                    pl.BlockSpec((tm, r_pad), lambda i, j, k: (i, 0)),   # u = x @ A^T
                    pl.BlockSpec((r_pad, tn), lambda i, j, k: (0, j)),   # B^T
                    pl.BlockSpec((1, tn), lambda i, j, k: (0, j)),       # bias
                ],
                out_specs=pl.BlockSpec((tm, tn), lambda i, j, k: (i, j)),
                scratch_shapes=[pltpu.VMEM((tm, tn), jnp.float32)],
            ),
            compiler_params=compiler_params,
            cost_estimate=pl.CostEstimate(
                flops=int(flops), transcendentals=0,
                bytes_accessed=int(bytes_accessed)),
        )(x_p, params["wt"], u_p, params["bt"], params["bias"])
    else:
        flops = 2 * Mp * Np * Kp
        bytes_accessed = ((Mp * Kp + Kp * Np) * cbytes
                          + Np * 4 + Mp * Np * obytes)
        out_p = pl.pallas_call(
            functools.partial(_plain_linear_kernel, tk=tk),
            out_shape=out_shape,
            grid_spec=pltpu.PrefetchScalarGridSpec(
                num_scalar_prefetch=0,
                grid=grid,
                in_specs=[
                    pl.BlockSpec((tm, Kp), lambda i, j, k: (i, 0)),      # x row panel
                    pl.BlockSpec((tk, tn), lambda i, j, k: (k, j)),      # W^T (K, N)
                    pl.BlockSpec((1, tn), lambda i, j, k: (0, j)),       # bias
                ],
                out_specs=pl.BlockSpec((tm, tn), lambda i, j, k: (i, j)),
                scratch_shapes=[pltpu.VMEM((tm, tn), jnp.float32)],
            ),
            compiler_params=compiler_params,
            cost_estimate=pl.CostEstimate(
                flops=int(flops), transcendentals=0,
                bytes_accessed=int(bytes_accessed)),
        )(x_p, params["wt"], params["bias"])

    out2d = out_p[:M, :out_features]
    return out2d.reshape(*orig_shape[:-1], out_features)


# ---------------------------------------------------------------------------
# Parameter init matching the PyTorch module
# ---------------------------------------------------------------------------

def init_lora_linear_params(key, in_features, out_features, rank):
    """Deterministic init matching the PyTorch module's __init__ / initial_weights()."""
    k_w, k_b, k_a = jax.random.split(key, 3)

    # nn.Linear default: kaiming_uniform_(weight, a=sqrt(5)) => U(-b, b), b = 1/sqrt(fan_in)
    w_bound = math.sqrt(1.0 / in_features)
    weight = jax.random.uniform(
        k_w, (out_features, in_features), jnp.float32, -w_bound, w_bound)
    # nn.Linear bias: U(-1/sqrt(fan_in), 1/sqrt(fan_in))
    b_bound = 1.0 / math.sqrt(in_features)
    bias = jax.random.uniform(k_b, (out_features,), jnp.float32, -b_bound, b_bound)
    # lora_a: kaiming_uniform_(a=sqrt(5)) with fan_in = in_features; lora_b: zeros
    a_bound = math.sqrt(1.0 / in_features)
    lora_a = jax.random.uniform(
        k_a, (rank, in_features), jnp.float32, -a_bound, a_bound)
    lora_b = jnp.zeros((out_features, rank), jnp.float32)
    return weight, bias, lora_a, lora_b


# ---------------------------------------------------------------------------
# Demo / correctness check
# ---------------------------------------------------------------------------

if __name__ == "__main__":
    key = jax.random.PRNGKey(0)
    k_params, k_x, k_lb, k_p2, k_x2, k_lb2 = jax.random.split(key, 6)

    # ----- Small case (single grid tile) -----------------------------------
    batch, seq = 2, 8
    in_features, out_features, rank = 32, 32, 16

    weight, bias, lora_a, lora_b = init_lora_linear_params(
        k_params, in_features, out_features, rank)
    # Module inits lora_b to zeros (LoRA term vanishes); use a nonzero lora_b in
    # the test so the low-rank path is actually exercised.
    lora_b = 0.1 * jax.random.normal(k_lb, (out_features, rank), jnp.float32)
    x = jax.random.normal(k_x, (batch, seq, in_features), jnp.float32)

    params = prepare_lora_linear(weight, bias, lora_a, lora_b,
                                 merge=True, rank=rank)
    out = jax.block_until_ready(lora_linear_forward(x, params))
    ref = x @ (weight + lora_b @ lora_a).T + bias
    assert out.shape == (batch, seq, out_features)
    assert jnp.allclose(out, ref, atol=3e-2, rtol=3e-2), (
        float(jnp.max(jnp.abs(out - ref))))

    # Frozen / non-merged path (plain linear kernel, no LoRA work).
    params_plain = prepare_lora_linear(weight, bias, merge=False, rank=rank)
    out_plain = jax.block_until_ready(lora_linear_forward(x, params_plain))
    ref_plain = x @ weight.T + bias
    assert jnp.allclose(out_plain, ref_plain, atol=3e-2, rtol=3e-2), (
        float(jnp.max(jnp.abs(out_plain - ref_plain))))

    # ----- Slightly larger case: exercises multiple N / K grid tiles --------
    in2, out2, rank2 = 384, 512, 8
    w2, b2, a2, bb2 = init_lora_linear_params(k_p2, in2, out2, rank2)
    bb2 = 0.05 * jax.random.normal(k_lb2, (out2, rank2), jnp.float32)
    x2 = jax.random.normal(k_x2, (batch, seq, in2), jnp.float32)

    params2 = prepare_lora_linear(w2, b2, a2, bb2, merge=True, rank=rank2,
                                  tn=256, tk=256)
    out2_ = jax.block_until_ready(lora_linear_forward(x2, params2))
    ref2 = x2 @ (w2 + bb2 @ a2).T + b2
    assert out2_.shape == (batch, seq, out2)
    assert jnp.allclose(out2_, ref2, atol=5e-2, rtol=5e-2), (
        float(jnp.max(jnp.abs(out2_ - ref2))))

    print("KERNEL_OK")
</pallas_src>

<mosaic_0001>
module attributes {stable_mosaic.version = 11 : i64} {
  func.func @_lora_linear_kernel(%arg0: i32, %arg1: i32, %arg2: i32, %arg3: memref<16x256xbf16, #tpu.memory_space<vmem>>, %arg4: memref<256x256xbf16, #tpu.memory_space<vmem>>, %arg5: memref<16x128xbf16, #tpu.memory_space<vmem>>, %arg6: memref<128x256xbf16, #tpu.memory_space<vmem>>, %arg7: memref<1x256xf32, #tpu.memory_space<vmem>>, %arg8: memref<16x256xf32, #tpu.memory_space<vmem>>, %arg9: memref<16x256xf32, #tpu.memory_space<vmem>>) attributes {dimension_semantics = [#tpu.dimension_semantics<parallel>, #tpu.dimension_semantics<parallel>, #tpu.dimension_semantics<arbitrary>], iteration_bounds = array<i64: 1, 1, 1>, scalar_prefetch = 0 : i64, scratch_operands = 1 : i64, tpu.core_type = #tpu.core_type<tc>, window_params = [{transform_indices = @transform_0, window_bounds = array<i64: 16, 256>}, {transform_indices = @transform_1, window_bounds = array<i64: 256, 256>}, {transform_indices = @transform_2, window_bounds = array<i64: 16, 128>}, {transform_indices = @transform_3, window_bounds = array<i64: 128, 256>}, {transform_indices = @transform_4, window_bounds = array<i64: 1, 256>}, {transform_indices = @transform_5, window_bounds = array<i64: 16, 256>}]} {
    %c256_i32 = arith.constant 256 : i32
    %0 = arith.muli %arg2, %c256_i32 : i32
    %1 = tpu.assume_multiple %0, 256 : i32
    %c0 = arith.constant 0 : index
    %2 = arith.index_cast %1 : i32 to index
    %3 = vector.load %arg3[%c0, %2] : memref<16x256xbf16, #tpu.memory_space<vmem>>, vector<16x256xbf16>
    %c0_0 = arith.constant 0 : index
    %c0_1 = arith.constant 0 : index
    %4 = vector.load %arg4[%c0_0, %c0_1] : memref<256x256xbf16, #tpu.memory_space<vmem>>, vector<256x256xbf16>
    %cst = arith.constant dense<0.000000e+00> : vector<16x256xf32>
    %5 = tpu.matmul %3, %4, %cst {dimension_numbers = #tpu.dot_dimension_numbers<[1], [0], [0], [1], [0, 0, 1, 1], [], []>} : vector<16x256xbf16>, vector<256x256xbf16>, vector<16x256xf32> -> vector<16x256xf32>
    %c0_i32 = arith.constant 0 : i32
    %6 = arith.cmpi eq, %arg2, %c0_i32 : i32
    %7 = arith.extui %6 : i1 to i32
    %c0_i32_2 = arith.constant 0 : i32
    %8 = arith.cmpi ne, %7, %c0_i32_2 : i32
    scf.if %8 {
      %c0_7 = arith.constant 0 : index
      %c0_8 = arith.constant 0 : index
      %15 = vector.load %arg9[%c0_7, %c0_8] : memref<16x256xf32, #tpu.memory_space<vmem>>, vector<16x256xf32>
      tpu.vector_store %arg9[%c0_7, %c0_8], %5 {strides = array<i32>} : memref<16x256xf32, #tpu.memory_space<vmem>>, vector<16x256xf32>,
    } else {
    }
    %c0_i32_3 = arith.constant 0 : i32
    %9 = arith.cmpi sgt, %arg2, %c0_i32_3 : i32
    %10 = arith.extui %9 : i1 to i32
    %c0_i32_4 = arith.constant 0 : i32
    %11 = arith.cmpi ne, %10, %c0_i32_4 : i32
    scf.if %11 {
      %c0_7 = arith.constant 0 : index
      %c0_8 = arith.constant 0 : index
      %15 = vector.load %arg9[%c0_7, %c0_8] : memref<16x256xf32, #tpu.memory_space<vmem>>, vector<16x256xf32>
      %16 = arith.addf %15, %5 : vector<16x256xf32>
      %c0_9 = arith.constant 0 : index
      %c0_10 = arith.constant 0 : index
      %17 = vector.load %arg9[%c0_9, %c0_10] : memref<16x256xf32, #tpu.memory_space<vmem>>, vector<16x256xf32>
      tpu.vector_store %arg9[%c0_9, %c0_10], %16 {strides = array<i32>} : memref<16x256xf32, #tpu.memory_space<vmem>>, vector<16x256xf32>,
    } else {
    }
    %c0_i32_5 = arith.constant 0 : i32
    %12 = arith.cmpi eq, %arg2, %c0_i32_5 : i32
    %13 = arith.extui %12 : i1 to i32
    %c0_i32_6 = arith.constant 0 : i32
    %14 = arith.cmpi ne, %13, %c0_i32_6 : i32
    scf.if %14 {
      %c0_7 = arith.constant 0 : index
      %c0_8 = arith.constant 0 : index
      %15 = vector.load %arg5[%c0_7, %c0_8] : memref<16x128xbf16, #tpu.memory_space<vmem>>, vector<16x128xbf16>
      %c0_9 = arith.constant 0 : index
      %c0_10 = arith.constant 0 : index
      %16 = vector.load %arg6[%c0_9, %c0_10] : memref<128x256xbf16, #tpu.memory_space<vmem>>, vector<128x256xbf16>
      %cst_11 = arith.constant dense<0.000000e+00> : vector<16x256xf32>
      %17 = tpu.matmul %15, %16, %cst_11 {dimension_numbers = #tpu.dot_dimension_numbers<[1], [0], [0], [1], [0, 0, 1, 1], [], []>} : vector<16x128xbf16>, vector<128x256xbf16>, vector<16x256xf32> -> vector<16x256xf32>
      %c0_12 = arith.constant 0 : index
      %c0_13 = arith.constant 0 : index
      %18 = vector.load %arg9[%c0_12, %c0_13] : memref<16x256xf32, #tpu.memory_space<vmem>>, vector<16x256xf32>
      %19 = arith.addf %18, %17 : vector<16x256xf32>
      %c0_14 = arith.constant 0 : index
      %c0_15 = arith.constant 0 : index
      %20 = vector.load %arg7[%c0_14, %c0_15] : memref<1x256xf32, #tpu.memory_space<vmem>>, vector<1x256xf32>
      %21 = vector.broadcast %20 : vector<1x256xf32> to vector<16x256xf32>
      %22 = arith.addf %19, %21 : vector<16x256xf32>
      %c0_16 = arith.constant 0 : index
      %c0_17 = arith.constant 0 : index
      %23 = vector.load %arg8[%c0_16, %c0_17] : memref<16x256xf32, #tpu.memory_space<vmem>>, vector<16x256xf32>
      tpu.vector_store %arg8[%c0_16, %c0_17], %22 {strides = array<i32>} : memref<16x256xf32, #tpu.memory_space<vmem>>, vector<16x256xf32>,
    } else {
    }
    return
  }
  func.func @transform_0(%arg0: i32, %arg1: i32, %arg2: i32) -> (i32, i32) {
    %c0_i32 = arith.constant 0 : i32
    %c0_i32_0 = arith.constant 0 : i32
    return %arg0, %c0_i32 : i32, i32
  }
  func.func @transform_1(%arg0: i32, %arg1: i32, %arg2: i32) -> (i32, i32) {
    %c0_i32 = arith.constant 0 : i32
    return %arg2, %arg1 : i32, i32
  }
  func.func @transform_2(%arg0: i32, %arg1: i32, %arg2: i32) -> (i32, i32) {
    %c0_i32 = arith.constant 0 : i32
    %c0_i32_0 = arith.constant 0 : i32
    return %arg0, %c0_i32 : i32, i32
  }
  func.func @transform_3(%arg0: i32, %arg1: i32, %arg2: i32) -> (i32, i32) {
    %c0_i32 = arith.constant 0 : i32
    %c0_i32_0 = arith.constant 0 : i32
    return %c0_i32, %arg1 : i32, i32
  }
  func.func @transform_4(%arg0: i32, %arg1: i32, %arg2: i32) -> (i32, i32) {
    %c0_i32 = arith.constant 0 : i32
    %c0_i32_0 = arith.constant 0 : i32
    return %c0_i32, %arg1 : i32, i32
  }
  func.func @transform_5(%arg0: i32, %arg1: i32, %arg2: i32) -> (i32, i32) {
    %c0_i32 = arith.constant 0 : i32
    return %arg0, %arg1 : i32, i32
  }
}

</mosaic_0001>

<bundles_post_ra>
// kernel: tpu_custom_call.1
= control target key start
LH: loop header
LB: loop body
LE: loop exit
PB: predicated region body
PF: predicated region fallthrough
CT: control target
= control target key end

     0   :  { %10 = vsyncpa [#allocation4], 0  ;;  %s934_s0 = inlined_call_operand.hbm [shape: bf16[16,256], index: 0, kind: input, shape index: {}]   ;;  %s935_s1 = inlined_call_operand.hbm [shape: bf16[256,256], index: 1, kind: input, shape index: {}]   ;;  %s936_s2 = inlined_call_operand.hbm [shape: bf16[16,128], index: 2, kind: input, shape index: {}]   ;;  %s937_s3 = inlined_call_operand.hbm [shape: bf16[128,256], index: 3, kind: input, shape index: {}]   ;;  %s938_s4 = inlined_call_operand.vmem [shape: f32[1,256], index: 4, kind: input, shape index: {}]   ;;  %s939_s5 = inlined_call_operand.hbm [shape: f32[16,256], index: 5, kind: output, shape index: {}]  }
   0x1   :  { %11 = vsyncpa [#allocation7], 0 }
   0x2   :  { %12 = vsyncpa [#allocation10], 0 }
   0x3   :  { %13 = vsyncpa [#allocation5], 0  ;;  %s813_s18 = smov [#allocation6]   ;;  %s814_s20 = smov [#allocation3]  }
   0x4   :  { %s31_s19 = sshll.u32 %s813_s18, 4  ;;  %s19_s21 = sshll.u32 %s814_s20, 4  ;;  %s32_s19 = int_to_ptr.vmem [resolvable:$true] %s31_s19  ;;  %s855_s21 = int_to_ptr.vmem [resolvable:$true] %s19_s21 }
   0x5   :  { %s695_s24 = scalar_lea.hbm %s935_s1, 4096 }
   0x6   :  { %p696_p0 = scmp.ne.s32.totalorder %s935_s1, %s695_s24  ;;  %p699_p1 = scmp.lt.u32.totalorder %s695_s24, %s935_s1 }
   0x8   :  { %p701_p2 = pnand %p699_p1, %p696_p0 }
   0xa   :  { %704 = shalt.err (!%p701_p2)
}
   0xb   :  { %s705_s29 = scalar_lea.vmem %s32_s19, 4096  ;;  %p710_p4 = scmp.lt.s32.totalorder %s32_s19, %s32_s19 }
   0xc   :  { %p706_p3 = scmp.ne.s32.totalorder %s32_s19, %s705_s29  ;;  %p711_p5 = scmp.lt.s32.totalorder %s705_s29, %s705_s29 }
   0xe   :  { %p712_p6 = por %p711_p5, %p710_p4 }
  0x10   :  { %p713_p7 = pnand %p712_p6, %p706_p3 }
  0x12   :  { %716 = shalt.err (!%p713_p7)
}
  0x13   :  { %s815_s30 = smov 128   ;;  %s816_s6 = smov 8  }
  0x14   :  { %37 = dma.hbm_to_vmem [thread:$0]  %s935_s1, 4096, %s32_s19, [#allocation7], %s815_s30, %s815_s30, %s816_s6  }
  0x15   :  { %s717_s11 = scalar_lea.hbm %s934_s0, 256 }
  0x16   :  { %p718_p8 = scmp.ne.s32.totalorder %s934_s0, %s717_s11  ;;  %p721_p9 = scmp.lt.u32.totalorder %s717_s11, %s934_s0 }
  0x18   :  { %p723_p10 = pnand %p721_p9, %p718_p8 }
  0x1a   :  { %726 = shalt.err (!%p723_p10)
}
  0x1b   :  { %s727_s16 = scalar_lea.vmem %s855_s21, 256  ;;  %p732_p12 = scmp.lt.s32.totalorder %s855_s21, %s855_s21 }
  0x1c   :  { %p728_p11 = scmp.ne.s32.totalorder %s855_s21, %s727_s16  ;;  %p733_p13 = scmp.lt.s32.totalorder %s727_s16, %s727_s16 }
  0x1e   :  { %p734_p0 = por %p733_p13, %p732_p12 }
  0x20   :  { %p735_p1 = pnand %p734_p0, %p728_p11 }
  0x22   :  { %738 = shalt.err (!%p735_p1)
}
  0x23   :  { %25 = dma.hbm_to_vmem [thread:$0]  %s934_s0, 256, %s855_s21, [#allocation4], %s815_s30, %s815_s30, %s816_s6  }
  0x24   :  { %s817_s18 = smov [#allocation8]   ;;  %s739_s23 = scalar_lea.hbm %s936_s2, 128 }
  0x25   :  { %s43_s19 = sshll.u32 %s817_s18, 4  ;;  %p740_p2 = scmp.ne.s32.totalorder %s936_s2, %s739_s23  ;;  %s44_s19 = int_to_ptr.vmem [resolvable:$true] %s43_s19 }
  0x26   :  { %p743_p3 = scmp.lt.u32.totalorder %s739_s23, %s936_s2 }
  0x28   :  { %p745_p4 = pnand %p743_p3, %p740_p2 }
  0x2a   :  { %748 = shalt.err (!%p745_p4)
}
  0x2b   :  { %s749_s28 = scalar_lea.vmem %s44_s19, 128  ;;  %p754_p6 = scmp.lt.s32.totalorder %s44_s19, %s44_s19 }
  0x2c   :  { %p750_p5 = scmp.ne.s32.totalorder %s44_s19, %s749_s28  ;;  %p755_p7 = scmp.lt.s32.totalorder %s749_s28, %s749_s28 }
  0x2e   :  { %p756_p8 = por %p755_p7, %p754_p6 }
  0x30   :  { %p757_p9 = pnand %p756_p8, %p750_p5 }
  0x32   :  { %760 = shalt.err (!%p757_p9)
}
  0x33   :  { %s818_s0 = smov 64   ;;  %s819_s21 = smov 4  }
  0x34   :  { %49 = dma.hbm_to_vmem [thread:$0]  %s936_s2, 128, %s44_s19, [#allocation7], %s818_s0, %s818_s0, %s819_s21  }
  0x35   :  { %s820_s8 = smov [#allocation9]   ;;  %s761_s12 = scalar_lea.hbm %s937_s3, 2048 }
  0x36   :  { %s55_s9 = sshll.u32 %s820_s8, 4  ;;  %p762_p10 = scmp.ne.s32.totalorder %s937_s3, %s761_s12  ;;  %s56_s9 = int_to_ptr.vmem [resolvable:$true] %s55_s9 }
  0x37   :  { %p765_p11 = scmp.lt.u32.totalorder %s761_s12, %s937_s3 }
  0x39   :  { %p767_p12 = pnand %p765_p11, %p762_p10 }
  0x3b   :  { %770 = shalt.err (!%p767_p12)
}
  0x3c   :  { %s771_s1 = scalar_lea.vmem %s56_s9, 2048  ;;  %p776_p0 = scmp.lt.s32.totalorder %s56_s9, %s56_s9 }
  0x3d   :  { %p772_p13 = scmp.ne.s32.totalorder %s56_s9, %s771_s1  ;;  %p777_p1 = scmp.lt.s32.totalorder %s771_s1, %s771_s1 }
  0x3f   :  { %p778_p2 = por %p777_p1, %p776_p0 }
  0x41   :  { %p779_p3 = pnand %p778_p2, %p772_p13 }
  0x43   :  { %782 = shalt.err (!%p779_p3)
}
  0x44   :  { %61 = dma.hbm_to_vmem [thread:$0]  %s937_s3, 2048, %s56_s9, [#allocation10], %s815_s30, %s815_s30, %s816_s6  }
  0x45   :  { %805 = dma.done.wait [#allocation4], 256  }
  0x46   :  { %806 = vsyncadd [#allocation4], 4294967040 }
  0x47   :  { %807 = dma.done.wait [#allocation7], 4224  }
  0x48   :  { %808 = vsyncadd [#allocation7], 4294963072 }
  0x49   :  { %809 = dma.done.wait [#allocation10], 2048  }
  0x4a   :  { %810 = vsyncadd [#allocation10], 4294965248  ;;  %v821_v0 = vmov 0   ;;  %v619_v1 = vld [vmem:[#allocation6 + $0x4] ss:$8 sps:$4 sm:$0xff]   ;;  %v513_v56 = vlaneseq  ;;  %s822_s6 = smov [#allocation11]  }
  0x4b   :  { %492 = vmatprep.mubr.bf16.mxu0 %v821_v0  ;;  %v621_v2 = vld [vmem:[#allocation6] ss:$8 sps:$4 sm:$0xff]   ;;  %286 = vmatprep.subr.bf16.mxu1 %v619_v1  ;;  %v622_v3 = vld [vmem:[#allocation6 + $0x14] ss:$8 sps:$4 sm:$0xff]   ;;  %v624_v4 = vld [vmem:[#allocation6 + $0x10] ss:$8 sps:$4 sm:$0xff]  }
  0x4c   :  { %287 = vmatpush1.bf16.msra.mxu1 %v621_v2  ;;  %v625_v5 = vld [vmem:[#allocation6 + $0x24] ss:$8 sps:$4 sm:$0xff]   ;;  %v627_v6 = vld [vmem:[#allocation6 + $0x20] ss:$8 sps:$4 sm:$0xff]   ;;  %v628_v7 = vld [vmem:[#allocation6 + $0x34] ss:$8 sps:$4 sm:$0xff]  }
  0x4d   :  { %288 = vmatprep.subr.bf16.mxu1 %v622_v3  ;;  %v630_v8 = vld [vmem:[#allocation6 + $0x30] ss:$8 sps:$4 sm:$0xff]   ;;  %v643_v9 = vld [vmem:[#allocation9 + $0x4] ss:$8 sps:$4 sm:$0xff]   ;;  %v649_v12 = vld [vmem:[#allocation9 + $0x14] ss:$8 sps:$4 sm:$0xff]  }
  0x4e   :  { %v645_v10 = vld [vmem:[#allocation9] ss:$8 sps:$4 sm:$0xff]   ;;  %v631_v11 = vld [vmem:[#allocation6 + $0x44] ss:$8 sps:$4 sm:$0xff]   ;;  %460 = vmatprep.subr.bf16.mxu0 %v643_v9  ;;  %v651_v13 = vld [vmem:[#allocation9 + $0x10] ss:$8 sps:$4 sm:$0xff]  }
  0x4f   :  { %461 = vmatpush1.bf16.msra.mxu0 %v645_v10  ;;  %v633_v14 = vld [vmem:[#allocation6 + $0x40] ss:$8 sps:$4 sm:$0xff]   ;;  %v634_v15 = vld [vmem:[#allocation6 + $0x54] ss:$8 sps:$4 sm:$0xff]   ;;  %v636_v18 = vld [vmem:[#allocation6 + $0x50] ss:$8 sps:$4 sm:$0xff]  }
  0x50   :  { %289 = vmatpush1.bf16.msra.mxu1 %v624_v4  ;;  %462 = vmatprep.subr.bf16.mxu0 %v649_v12  ;;  %v655_v16 = vld [vmem:[#allocation9 + $0x24] ss:$8 sps:$4 sm:$0xff]   ;;  %v657_v17 = vld [vmem:[#allocation9 + $0x20] ss:$8 sps:$4 sm:$0xff]   ;;  %v661_v19 = vld [vmem:[#allocation9 + $0x34] ss:$8 sps:$4 sm:$0xff]  }
  0x51   :  { %290 = vmatprep.subr.bf16.mxu1 %v625_v5  ;;  %v637_v20 = vld [vmem:[#allocation6 + $0x64] ss:$8 sps:$4 sm:$0xff]   ;;  %v663_v21 = vld [vmem:[#allocation9 + $0x30] ss:$8 sps:$4 sm:$0xff]   ;;  %v640_v24 = vld [vmem:[#allocation6 + $0x74] ss:$8 sps:$4 sm:$0xff]  }
  0x52   :  { %v639_v22 = vld [vmem:[#allocation6 + $0x60] ss:$8 sps:$4 sm:$0xff]   ;;  %v667_v23 = vld [vmem:[#allocation9 + $0x44] ss:$8 sps:$4 sm:$0xff]   ;;  %v642_v26 = vld [vmem:[#allocation6 + $0x70] ss:$8 sps:$4 sm:$0xff]  }
  0x53   :  { %463 = vmatpush1.bf16.msra.mxu0 %v651_v13  ;;  %v669_v25 = vld [vmem:[#allocation9 + $0x40] ss:$8 sps:$4 sm:$0xff]   ;;  %v673_v27 = vld [vmem:[#allocation9 + $0x54] ss:$8 sps:$4 sm:$0xff]   ;;  %v675_v29 = vld [vmem:[#allocation9 + $0x50] ss:$8 sps:$4 sm:$0xff]  }
  0x54   :  { %291 = vmatpush1.bf16.msra.mxu1 %v627_v6  ;;  %464 = vmatprep.subr.bf16.mxu0 %v655_v16  ;;  %v646_v28 = vld [vmem:[#allocation6 + $0x84] ss:$8 sps:$4 sm:$0xff]   ;;  %v648_v30 = vld [vmem:[#allocation6 + $0x80] ss:$8 sps:$4 sm:$0xff]   ;;  %v652_v32 = vld [vmem:[#allocation6 + $0x94] ss:$8 sps:$4 sm:$0xff]  }
  0x55   :  { %292 = vmatprep.subr.bf16.mxu1 %v628_v7  ;;  %v679_v31 = vld [vmem:[#allocation9 + $0x64] ss:$8 sps:$4 sm:$0xff]   ;;  %v681_v33 = vld [vmem:[#allocation9 + $0x60] ss:$8 sps:$4 sm:$0xff]   ;;  %v685_v36 = vld [vmem:[#allocation9 + $0x74] ss:$8 sps:$4 sm:$0xff]  }
  0x56   :  { %v694_v34 = vld [vmem:[#allocation3 + $0x4] ss:$8 sps:$4 sm:$0xff]   ;;  %v654_v35 = vld [vmem:[#allocation6 + $0x90] ss:$8 sps:$4 sm:$0xff]   ;;  %v658_v37 = vld [vmem:[#allocation6 + $0xa4] ss:$8 sps:$4 sm:$0xff]  }
  0x57   :  { %465 = vmatpush1.bf16.msra.mxu0 %v657_v17  ;;  %318 = vmatprep.mubr.bf16.mxu1 %v694_v34  ;;  %v687_v38 = vld [vmem:[#allocation9 + $0x70] ss:$8 sps:$4 sm:$0xff]   ;;  %v664_v40 = vld [vmem:[#allocation6 + $0xb4] ss:$8 sps:$4 sm:$0xff]   ;;  %v670_v43 = vld [vmem:[#allocation6 + $0xc4] ss:$8 sps:$4 sm:$0xff]  }
  0x58   :  { %293 = vmatpush1.bf16.msra.mxu1 %v630_v8  ;;  %466 = vmatprep.subr.bf16.mxu0 %v661_v19  ;;  %v660_v39 = vld [vmem:[#allocation6 + $0xa0] ss:$8 sps:$4 sm:$0xff]   ;;  %v666_v42 = vld [vmem:[#allocation6 + $0xb0] ss:$8 sps:$4 sm:$0xff]   ;;  %v676_v45 = vld [vmem:[#allocation6 + $0xd4] ss:$8 sps:$4 sm:$0xff]  }
  0x59   :  { %294 = vmatprep.subr.bf16.mxu1 %v631_v11  ;;  %v691_v41 = vld [vmem:[#allocation8] sm:$0xff]   ;;  %v678_v46 = vld [vmem:[#allocation6 + $0xd0] ss:$8 sps:$4 sm:$0xff]   ;;  %v688_v49 = vld [vmem:[#allocation6 + $0xf4] ss:$8 sps:$4 sm:$0xff]   ;;  %v514_v57 = vshrl.u32 %v513_v56, 7 }
  0x5a   :  { %v672_v44 = vld [vmem:[#allocation6 + $0xc0] ss:$8 sps:$4 sm:$0xff]   ;;  %v682_v47 = vld [vmem:[#allocation6 + $0xe4] ss:$8 sps:$4 sm:$0xff]   ;;  %v690_v50 = vld [vmem:[#allocation6 + $0xf0] ss:$8 sps:$4 sm:$0xff]  }
  0x5b   :  { %467 = vmatpush1.bf16.msra.mxu0 %v663_v21  ;;  %v684_v48 = vld [vmem:[#allocation6 + $0xe0] ss:$8 sps:$4 sm:$0xff]   ;;  %v692_v51 = vld [vmem:[#allocation3] ss:$8 sps:$4 sm:$0xff]   ;;  %v515_v58 = vsub.s32 0, %v514_v57  ;;  %v519_v60 = vsub.s32 1, %v514_v57 }
  0x5c   :  { %295 = vmatpush1.bf16.msra.mxu1 %v633_v14  ;;  %468 = vmatprep.subr.bf16.mxu0 %v667_v23  ;;  %v511_v59 = vld [vmem:[%s938_s4] sm:$0x3]  ;;  %s536_s18 = sshll.u32 %s822_s6, 4  ;;  %s537_s18 = int_to_ptr.vmem [resolvable:$true] %s536_s18 }
  0x5d   :  { %296 = vmatprep.subr.bf16.mxu1 %v634_v15  ;;  %v516_v61 = vrot.slane %v511_v59, %v515_v58  ;;  %v520_v63 = vrot.slane %v511_v59, %v519_v60  ;;  %s783_s4 = scalar_lea.vmem %s537_s18, 512  ;;  %p788_p5 = scmp.lt.s32.totalorder %s537_s18, %s537_s18 }
  0x5e   :  { %p784_p4 = scmp.ne.s32.totalorder %s537_s18, %s783_s4  ;;  %p789_p6 = scmp.lt.s32.totalorder %s783_s4, %s783_s4 }
  0x5f   :  { %469 = vmatpush1.bf16.msra.mxu0 %v669_v25 }
  0x60   :  { %297 = vmatpush1.bf16.msra.mxu1 %v636_v18  ;;  %470 = vmatprep.subr.bf16.mxu0 %v673_v27  ;;  %p790_p7 = por %p789_p6, %p788_p5 }
  0x61   :  { %298 = vmatprep.subr.bf16.mxu1 %v637_v20 }
  0x62   :  { %p791_p8 = pnand %p790_p7, %p784_p4 }
  0x63   :  { %471 = vmatpush1.bf16.msra.mxu0 %v675_v29 }
  0x64   :  { %299 = vmatpush1.bf16.msra.mxu1 %v639_v22  ;;  %472 = vmatprep.subr.bf16.mxu0 %v679_v31 }
  0x65   :  { %300 = vmatprep.subr.bf16.mxu1 %v640_v24 }
  0x67   :  { %473 = vmatpush1.bf16.msra.mxu0 %v681_v33 }
  0x68   :  { %301 = vmatpush1.bf16.msra.mxu1 %v642_v26  ;;  %474 = vmatprep.subr.bf16.mxu0 %v685_v36 }
  0x69   :  { %302 = vmatprep.subr.bf16.mxu1 %v646_v28 }
  0x6b   :  { %475 = vmatpush1.bf16.msra.mxu0 %v687_v38 }
  0x6c   :  { %303 = vmatpush1.bf16.msra.mxu1 %v648_v30 }
  0x6d   :  { %304 = vmatprep.subr.bf16.mxu1 %v652_v32 }
  0x6e   :  { %493 = vmatmul.mubr.bf16.vlgmr.msra.gmra.mrb[0].mxu0 %v691_v41 }
  0x70   :  { %305 = vmatpush1.bf16.msra.mxu1 %v654_v35 }
  0x71   :  { %306 = vmatprep.subr.bf16.mxu1 %v658_v37 }
  0x74   :  { %307 = vmatpush1.bf16.msra.mxu1 %v660_v39 }
  0x75   :  { %308 = vmatprep.subr.bf16.mxu1 %v664_v40 }
  0x78   :  { %309 = vmatpush1.bf16.msra.mxu1 %v666_v42 }
  0x79   :  { %310 = vmatprep.subr.bf16.mxu1 %v670_v43 }
  0x7c   :  { %311 = vmatpush1.bf16.msra.mxu1 %v672_v44 }
  0x7d   :  { %312 = vmatprep.subr.bf16.mxu1 %v676_v45 }
  0x80   :  { %313 = vmatpush1.bf16.msra.mxu1 %v678_v46 }
  0x81   :  { %314 = vmatprep.subr.bf16.mxu1 %v682_v47 }
  0x84   :  { %315 = vmatpush1.bf16.msra.mxu1 %v684_v48 }
  0x85   :  { %316 = vmatprep.subr.bf16.mxu1 %v688_v49 }
  0x88   :  { %317 = vmatpush1.bf16.msra.mxu1 %v690_v50 }
  0x8b   :  { %319 = vmatmul.mubr.bf16.vlgmr.msra.gmra.mrb[0].mxu1 %v692_v51 }
 0x141   :  { %v494_v52 = vpop.f32.mrb[0].mxu0 }
 0x142   :  { %v496_v53 = vpop.f32.mrb[1].mxu0 }
 0x143   :  { %v498_v54 = vpop.f32.mrb[2].mxu0 }
 0x144   :  { %v500_v55 = vpop.f32.mrb[3].mxu0 }
 0x15e   :  { %v320_v62 = vpop.f32.mrb[0].mxu1 }
 0x15f   :  { %v507_v0 = vadd.f32 %v494_v52, %v320_v62  ;;  %v322_v1 = vpop.f32.mrb[1].mxu1 }
 0x160   :  { %v508_v2 = vadd.f32 %v496_v53, %v322_v1  ;;  %v324_v3 = vpop.f32.mrb[2].mxu1 }
 0x161   :  { %v523_v4 = vadd.f32 %v516_v61, %v507_v0  ;;  %v509_v5 = vadd.f32 %v498_v54, %v324_v3  ;;  %v326_v6 = vpop.f32.mrb[3].mxu1 }
 0x162   :  { %v524_v7 = vadd.f32 %v520_v63, %v508_v2  ;;  %v510_v8 = vadd.f32 %v500_v55, %v326_v6 }
 0x163   :  { %527 = vst [vmem:[#allocation11] sm:$0xff] %v523_v4  ;;  %v525_v9 = vadd.f32 %v516_v61, %v509_v5 }
 0x164   :  { %528 = vst [vmem:[#allocation11 + $0x8] sm:$0xff] %v524_v7  ;;  %v526_v10 = vadd.f32 %v520_v63, %v510_v8 }
 0x165   :  { %529 = vst [vmem:[#allocation11 + $0x10] sm:$0xff] %v525_v9 }
 0x166   :  { %530 = vst [vmem:[#allocation11 + $0x18] sm:$0xff] %v526_v10 }
 0x167   :  { %794 = shalt.err (!%p791_p8)
}
 0x168   :  { %s795_s22 = scalar_lea.hbm %s939_s5, 512 }
 0x169   :  { %p796_p9 = scmp.ne.s32.totalorder %s939_s5, %s795_s22  ;;  %p799_p10 = scmp.lt.u32.totalorder %s795_s22, %s939_s5 }
 0x16b   :  { %p801_p11 = pnand %p799_p10, %p796_p9 }
 0x16d   :  { %804 = shalt.err (!%p801_p11)
}
 0x16e   :  { %s823_s27 = smov 256   ;;  %s824_s28 = smov 16  }
 0x16f   :  { %542 = dma.vmem_to_hbm [thread:$0]  %s537_s18, 512, %s939_s5, [#allocation5], %s823_s27, %s823_s27, %s824_s28  }
 0x170   :  { %811 = dma.done.wait [#allocation5], 512  }
 0x171   :  { %812 = vsyncadd [#allocation5], 4294966784 }
 0x172   :  { %546 = vsyncpa [#allocation4], 1 }
 0x173   :  { %547 = vsyncpa [#allocation7], 1 }
 0x174   :  { %548 = vsyncpa [#allocation10], 1 }
 0x175   :  { %549 = vsyncpa [#allocation5], 1 }

</bundles_post_ra>
